<compile_context>
chip_gen: v7x
topology: tpu7x:2x2x1
jax: 0.10.0
libtpu: 0.0.40
codegen_flags: <defaults>
</compile_context>

<pallas_src>
import jax
import jax.numpy as jnp
from jax.experimental import pallas as pl
from jax.experimental.pallas import tpu as pltpu


def simple_multiplex_kernel(x_ref, w1_ref, b1_ref, w2_ref, b2_ref,
                            w3_ref, b3_ref, o_ref):
    # x_ref:  (tm, D)   f32  (batch rows on sublanes)
    # w1_ref: (H1, D)   f32  (PyTorch Linear layout: out x in)
    # b1_ref: (H1, 1)   f32
    # w2_ref: (H2, H1)  f32
    # b2_ref: (H2, 1)   f32
    # w3_ref: (H2, 1)   f32  (output-head weight stored as a column)
    # b3_ref: (1, 1)    f32
    # o_ref:  (1, tm)   f32  (lane-dense: batch on lanes)

    # Layer 1: h1^T = W1 @ x^T — "NT" dot_general (contract last dims of both),
    # so no explicit transpose is materialized.  f32 accumulation.
    h1 = jax.lax.dot_general(
        w1_ref[...], x_ref[...],
        dimension_numbers=(((1,), (1,)), ((), ())),
        preferred_element_type=jnp.float32)                        # (H1, tm)
    h1 = jnp.maximum(h1 + b1_ref[...], 0.0)

    # Layer 2: h2^T = W2 @ h1^T  (small f32 MXU matmul, hides under DMA).
    h2 = jnp.dot(w2_ref[...], h1,
                 preferred_element_type=jnp.float32)               # (H2, tm)
    h2 = jnp.maximum(h2 + b2_ref[...], 0.0)

    # Output head (5 -> 1): broadcast-multiply + sublane reduction gives the
    # lane-dense (1, tm) row directly.
    logits = jnp.sum(w3_ref[...] * h2, axis=0, keepdims=True) + b3_ref[...]
    o_ref[...] = jax.nn.sigmoid(logits)                            # (1, tm)


def _round_up(n, m):
    return ((n + m - 1) // m) * m


def _default_tm():
    """Generation-aware default batch tile (rows)."""
    try:
        kind = jax.devices()[0].device_kind.lower()
    except Exception:
        return 8192
    if "v5" in kind:          # v5e: 16 MiB default scoped VMEM, ~0.82 TB/s HBM
        return 8192
    return 16384              # v6e / v7x


def simple_multiplex_forward(x, params, *, tm=None):
    """x: (B, data_dim) float32. Returns sigmoid output of shape (B, 1) float32."""
    w1, b1, w2, b2, w3, b3 = params
    B, D = x.shape
    H1 = w1.shape[0]   # 10
    H2 = w2.shape[0]   # 5

    if tm is None:
        tm = _default_tm()
    # Lane-dense tile (multiple of 128); cap so the grid has >= 2 steps whenever
    # B > 128 (keeps both v7x TensorCores busy) and never exceeds what B needs.
    tm = max(128, min(_round_up(tm, 128), _round_up(pl.cdiv(B, 2), 128)))
    grid = (pl.cdiv(B, tm),)   # ragged last block handled by Pallas (no jnp.pad copy)

    out_t = pl.pallas_call(
        simple_multiplex_kernel,
        out_shape=jax.ShapeDtypeStruct((1, B), jnp.float32),
        grid=grid,
        in_specs=[
            pl.BlockSpec((tm, D), lambda i: (i, 0)),    # x tile (per grid step), f32
            pl.BlockSpec((H1, D), lambda i: (0, 0)),    # W1 (resident)
            pl.BlockSpec((H1, 1), lambda i: (0, 0)),    # b1
            pl.BlockSpec((H2, H1), lambda i: (0, 0)),   # W2
            pl.BlockSpec((H2, 1), lambda i: (0, 0)),    # b2
            pl.BlockSpec((H2, 1), lambda i: (0, 0)),    # W3 column
            pl.BlockSpec((1, 1), lambda i: (0, 0)),     # b3
        ],
        out_specs=pl.BlockSpec((1, tm), lambda i: (0, i)),   # lane-dense output slab
        compiler_params=pltpu.CompilerParams(
            dimension_semantics=("parallel",),        # lets v7x split batch over 2 TCs
            vmem_limit_bytes=48 * 1024 * 1024),       # explicit: fits v7x's 64 MiB VMEM
    )(x, w1, b1, w2, b2, w3, b3)

    return out_t.reshape(B, 1)


def init_params(key, data_dim):
    """Deterministic synthetic params matching the PyTorch module shapes.

    Weights kept in PyTorch Linear layout (out_dim, in_dim); output-head weight
    stored as a (5, 1) column.  Biases are column vectors so they broadcast
    along the lane (batch) axis inside the kernel.
    """
    k1, k2, k3, k4, k5, k6 = jax.random.split(key, 6)
    s = 0.5
    w1 = jax.random.normal(k1, (10, data_dim), jnp.float32) * s
    b1 = jax.random.normal(k2, (10, 1), jnp.float32) * s
    w2 = jax.random.normal(k3, (5, 10), jnp.float32) * s
    b2 = jax.random.normal(k4, (5, 1), jnp.float32) * s
    w3 = jax.random.normal(k5, (5, 1), jnp.float32) * s
    b3 = jax.random.normal(k6, (1, 1), jnp.float32) * s
    return (w1, b1, w2, b2, w3, b3)


def reference_forward(x, params):
    w1, b1, w2, b2, w3, b3 = params
    hp = jax.lax.Precision.HIGHEST
    h1 = jnp.maximum(jnp.dot(x, w1.T, precision=hp) + b1.reshape(1, -1), 0.0)
    h2 = jnp.maximum(jnp.dot(h1, w2.T, precision=hp) + b2.reshape(1, -1), 0.0)
    return jax.nn.sigmoid(jnp.dot(h2, w3, precision=hp) + b3.reshape(1, -1))


if __name__ == "__main__":
    key = jax.random.PRNGKey(0)
    kx, kp = jax.random.split(key)

    # Non-multiple batch so the ragged last block path is exercised; small data_dim.
    batch, data_dim = 500, 32
    x = jax.random.normal(kx, (batch, data_dim), jnp.float32)
    params = init_params(kp, data_dim)

    out = simple_multiplex_forward(x, params)   # tm clamps to 256 -> 2 grid steps
    out = jax.block_until_ready(out)
    assert out.shape == (batch, 1)
    assert bool(jnp.all(jnp.isfinite(out))), "non-finite values in valid rows"

    # f32 reference (module semantics); kernel is f32 end-to-end now.
    ref_f32 = reference_forward(x, params)
    assert jnp.allclose(out, ref_f32, atol=2e-2, rtol=0), "mismatch vs f32 ref"

    print("KERNEL_OK")
</pallas_src>

<mosaic_0001>
module attributes {stable_mosaic.version = 11 : i64} {
  func.func @simple_multiplex_kernel(%arg0: i32, %arg1: memref<256x32xf32, #tpu.memory_space<vmem>>, %arg2: memref<10x32xf32, #tpu.memory_space<vmem>>, %arg3: memref<10x1xf32, #tpu.memory_space<vmem>>, %arg4: memref<5x10xf32, #tpu.memory_space<vmem>>, %arg5: memref<5x1xf32, #tpu.memory_space<vmem>>, %arg6: memref<5x1xf32, #tpu.memory_space<vmem>>, %arg7: memref<1x1xf32, #tpu.memory_space<vmem>>, %arg8: memref<1x256xf32, #tpu.memory_space<vmem>>) attributes {dimension_semantics = [#tpu.dimension_semantics<parallel>], iteration_bounds = array<i64: 2>, scalar_prefetch = 0 : i64, scratch_operands = 0 : i64, tpu.core_type = #tpu.core_type<tc>, window_params = [{transform_indices = @transform_0, window_bounds = array<i64: 256, 32>}, {pipeline_mode = #tpu.pipeline_mode<synchronous>, transform_indices = @transform_1, window_bounds = array<i64: 10, 32>}, {pipeline_mode = #tpu.pipeline_mode<synchronous>, transform_indices = @transform_2, window_bounds = array<i64: 10, 1>}, {pipeline_mode = #tpu.pipeline_mode<synchronous>, transform_indices = @transform_3, window_bounds = array<i64: 5, 10>}, {pipeline_mode = #tpu.pipeline_mode<synchronous>, transform_indices = @transform_4, window_bounds = array<i64: 5, 1>}, {pipeline_mode = #tpu.pipeline_mode<synchronous>, transform_indices = @transform_5, window_bounds = array<i64: 5, 1>}, {pipeline_mode = #tpu.pipeline_mode<synchronous>, transform_indices = @transform_6, window_bounds = array<i64: 1, 1>}, {transform_indices = @transform_7, window_bounds = array<i64: 1, 256>}]} {
    %c0 = arith.constant 0 : index
    %c0_0 = arith.constant 0 : index
    %0 = vector.load %arg2[%c0, %c0_0] : memref<10x32xf32, #tpu.memory_space<vmem>>, vector<10x32xf32>
    %c0_1 = arith.constant 0 : index
    %c0_2 = arith.constant 0 : index
    %1 = vector.load %arg1[%c0_1, %c0_2] : memref<256x32xf32, #tpu.memory_space<vmem>>, vector<256x32xf32>
    %cst = arith.constant dense<0.000000e+00> : vector<10x256xf32>
    %2 = tpu.matmul %0, %1, %cst {dimension_numbers = #tpu.dot_dimension_numbers<[1], [1], [0], [0], [0, 0, 1, 0], [], []>} : vector<10x32xf32>, vector<256x32xf32>, vector<10x256xf32> -> vector<10x256xf32>
    %c0_3 = arith.constant 0 : index
    %c0_4 = arith.constant 0 : index
    %3 = vector.load %arg3[%c0_3, %c0_4] : memref<10x1xf32, #tpu.memory_space<vmem>>, vector<10x1xf32>
    %4 = vector.broadcast %3 : vector<10x1xf32> to vector<10x256xf32>
    %5 = arith.addf %2, %4 : vector<10x256xf32>
    %cst_5 = arith.constant 0.000000e+00 : f32
    %6 = vector.broadcast %cst_5 : f32 to vector<10x256xf32>
    %7 = arith.maximumf %5, %6 : vector<10x256xf32>
    %c0_6 = arith.constant 0 : index
    %c0_7 = arith.constant 0 : index
    %8 = vector.load %arg4[%c0_6, %c0_7] : memref<5x10xf32, #tpu.memory_space<vmem>>, vector<5x10xf32>
    %cst_8 = arith.constant dense<0.000000e+00> : vector<5x256xf32>
    %9 = tpu.matmul %8, %7, %cst_8 {dimension_numbers = #tpu.dot_dimension_numbers<[1], [0], [0], [1], [0, 0, 1, 1], [], []>} : vector<5x10xf32>, vector<10x256xf32>, vector<5x256xf32> -> vector<5x256xf32>
    %c0_9 = arith.constant 0 : index
    %c0_10 = arith.constant 0 : index
    %10 = vector.load %arg5[%c0_9, %c0_10] : memref<5x1xf32, #tpu.memory_space<vmem>>, vector<5x1xf32>
    %11 = vector.broadcast %10 : vector<5x1xf32> to vector<5x256xf32>
    %12 = arith.addf %9, %11 : vector<5x256xf32>
    %cst_11 = arith.constant 0.000000e+00 : f32
    %13 = vector.broadcast %cst_11 : f32 to vector<5x256xf32>
    %14 = arith.maximumf %12, %13 : vector<5x256xf32>
    %c0_12 = arith.constant 0 : index
    %c0_13 = arith.constant 0 : index
    %15 = vector.load %arg6[%c0_12, %c0_13] : memref<5x1xf32, #tpu.memory_space<vmem>>, vector<5x1xf32>
    %16 = vector.broadcast %15 : vector<5x1xf32> to vector<5x256xf32>
    %17 = arith.mulf %16, %14 : vector<5x256xf32>
    %cst_14 = arith.constant dense<0.000000e+00> : vector<256xf32>
    %18 = vector.multi_reduction <add>, %17, %cst_14 [0] : vector<5x256xf32> to vector<256xf32>
    %19 = vector.shape_cast %18 : vector<256xf32> to vector<1x256xf32>
    %c0_15 = arith.constant 0 : index
    %c0_16 = arith.constant 0 : index
    %20 = vector.load %arg7[%c0_15, %c0_16] : memref<1x1xf32, #tpu.memory_space<vmem>>, vector<1x1xf32>
    %21 = vector.broadcast %20 : vector<1x1xf32> to vector<1x256xf32>
    %22 = arith.addf %19, %21 : vector<1x256xf32>
    %23 = arith.negf %22 : vector<1x256xf32>
    %24 = math.exp %23 : vector<1x256xf32>
    %cst_17 = arith.constant 1.000000e+00 : f32
    %25 = vector.broadcast %cst_17 : f32 to vector<1x256xf32>
    %26 = arith.addf %25, %24 : vector<1x256xf32>
    %27 = arith.divf %25, %26 : vector<1x256xf32>
    %c0_18 = arith.constant 0 : index
    %c0_19 = arith.constant 0 : index
    %28 = vector.load %arg8[%c0_18, %c0_19] : memref<1x256xf32, #tpu.memory_space<vmem>>, vector<1x256xf32>
    tpu.vector_store %arg8[%c0_18, %c0_19], %27 {strides = array<i32>} : memref<1x256xf32, #tpu.memory_space<vmem>>, vector<1x256xf32>,
    return
  }
  func.func @transform_0(%arg0: i32) -> (i32, i32) {
    %c0_i32 = arith.constant 0 : i32
    %c0_i32_0 = arith.constant 0 : i32
    return %arg0, %c0_i32 : i32, i32
  }
  func.func @transform_1(%arg0: i32) -> (i32, i32) {
    %c0_i32 = arith.constant 0 : i32
    %c0_i32_0 = arith.constant 0 : i32
    %c0_i32_1 = arith.constant 0 : i32
    return %c0_i32, %c0_i32_0 : i32, i32
  }
  func.func @transform_2(%arg0: i32) -> (i32, i32) {
    %c0_i32 = arith.constant 0 : i32
    %c0_i32_0 = arith.constant 0 : i32
    %c0_i32_1 = arith.constant 0 : i32
    return %c0_i32, %c0_i32_0 : i32, i32
  }
  func.func @transform_3(%arg0: i32) -> (i32, i32) {
    %c0_i32 = arith.constant 0 : i32
    %c0_i32_0 = arith.constant 0 : i32
    %c0_i32_1 = arith.constant 0 : i32
    return %c0_i32, %c0_i32_0 : i32, i32
  }
  func.func @transform_4(%arg0: i32) -> (i32, i32) {
    %c0_i32 = arith.constant 0 : i32
    %c0_i32_0 = arith.constant 0 : i32
    %c0_i32_1 = arith.constant 0 : i32
    return %c0_i32, %c0_i32_0 : i32, i32
  }
  func.func @transform_5(%arg0: i32) -> (i32, i32) {
    %c0_i32 = arith.constant 0 : i32
    %c0_i32_0 = arith.constant 0 : i32
    %c0_i32_1 = arith.constant 0 : i32
    return %c0_i32, %c0_i32_0 : i32, i32
  }
  func.func @transform_6(%arg0: i32) -> (i32, i32) {
    %c0_i32 = arith.constant 0 : i32
    %c0_i32_0 = arith.constant 0 : i32
    %c0_i32_1 = arith.constant 0 : i32
    return %c0_i32, %c0_i32_0 : i32, i32
  }
  func.func @transform_7(%arg0: i32) -> (i32, i32) {
    %c0_i32 = arith.constant 0 : i32
    %c0_i32_0 = arith.constant 0 : i32
    return %c0_i32, %arg0 : i32, i32
  }
}

</mosaic_0001>

<bundles_post_ra>
// kernel: tpu_custom_call.1
= control target key start
LH: loop header
LB: loop body
LE: loop exit
PB: predicated region body
PF: predicated region fallthrough
CT: control target
= control target key end

     0   :  { %s1274_s0 = inlined_call_operand.vmem [shape: f32[500,32], index: 0, kind: input, shape index: {}]   ;;  %s1275_s1 = inlined_call_operand.vmem [shape: f32[10,32], index: 1, kind: input, shape index: {}]   ;;  %s1276_s2 = inlined_call_operand.vmem [shape: f32[10,1], index: 2, kind: input, shape index: {}]   ;;  %s1277_s3 = inlined_call_operand.vmem [shape: f32[5,10], index: 3, kind: input, shape index: {}]   ;;  %s1278_s4 = inlined_call_operand.vmem [shape: f32[5,1], index: 4, kind: input, shape index: {}]   ;;  %s1279_s5 = inlined_call_operand.vmem [shape: f32[5,1], index: 5, kind: input, shape index: {}]   ;;  %s1280_s6 = inlined_call_operand.<no memory space> [shape: f32[1,1], index: 6, kind: input, shape index: {}]   ;;  %s1281_s7 = inlined_call_operand.hbm [shape: f32[1,500], index: 7, kind: output, shape index: {}]  }
   0x1   :  { %v12_v0 = vstv %s1280_s6 }
   0x2   :  { %13 = vst [vmem:[#allocation2] sm:$0x1] %v12_v0 }
   0x3   :  { %14 = vsyncpa [#allocation4], 0 }
   0x4   :  { %16 = vsyncpa [#allocation4 + $0x1], 0  ;;  %s1074_s26 = smov 0   ;;  %s1076_s27 = smov 0  }
   0x5   :  { %s1078_s28 = smov 0   ;;  %s1080_s29 = smov 0  }
   0x6 LB: > { %s766_s6 = sadd.s32 4294967295, %s1024_s29   ;;  %s767_s30 = sadd.s32 4294967294, %s1024_s29   ;;  %s1024_s29 = sphi %s1080_s29, %s1289_s29   ;;  %s1020_s28 = sphi %s1078_s28, %s1288_s28   ;;  %s1016_s27 = sphi %s1076_s27, %s1287_s27   ;;  %s1012_s26 = sphi %s1074_s26, %s1286_s26  }
   0x7   : > { %s1097_s8 = sadd.s32 1, %s1024_s29   ;;  %s181_s9 = sadd.s32 1, %s1020_s28 }
   0x8   : > { %s178_s10 = ssub.s32 %s1024_s29, %s1097_s8  ;;  %p191_p0 = scmp.ne.s32.totalorder %s1020_s28, %s1016_s27 }
   0x9   : > { %p179_p1 = scmp.eq.s32.totalorder %s178_s10, 0  ;;  %p192_p2 = scmp.eq.s32.totalorder %s766_s6, 1 }
   0xa   : > { %p197_p3 = scmp.ne.s32.totalorder %s1016_s27, %s1012_s26  ;;  %p198_p4 = scmp.eq.s32.totalorder %s767_s30, 1 }
   0xb   : > { %s1107_s11 = scalar_select %p179_p1, %s1020_s28, %s181_s9  }
   0xc   : > { %p1109_p5 = por %p192_p2, %p191_p0  ;;  %p1113_p6 = por %p198_p4, %p197_p3 }
   0xd   : > { %p770_p7 = scmp.ge.s32.totalorder %s1024_s29, 1  ;;  %p251_p8 = scmp.lt.s32.totalorder %s1024_s29, 3 }
   0xf   : > { %p252_p9 = pnand %p770_p7, %p251_p8 }
  0x10   : > { %s1119_s14 = sshll.u32 (!%p252_p9), %s766_s6, 5  ;;  %vm348_vm0 = vcmask (!%p252_p9), 261120   ;;  %v1124_v1 = vld [vmem:[%s1275_s1] sm:$0xff] (!%p252_p9)  ;;  %v1026_v2 = vmov (!%p252_p9), 0   ;;  %v337_v4 = vld [vmem:[%s1276_s2 + $0x8] sm:$0x3] (!%p252_p9) }
  0x11   : > { %255 = sbr.rel (%p252_p9) target bundleno = 602 (0x25a), region = 48  ;;  %p292_p10 = scmp.lt.s32.totalorder (!%p252_p9), %s1119_s14, 62  ;;  %851 = vmatprep.mubr.msk.f32.mxu0 (!%p252_p9), %vm348_vm0, %v1124_v1  ;;  %952 = vset.pattern.permute.xlu0 (!%p252_p9), %v1026_v2  ;;  %v336_v3 = vld [vmem:[%s1276_s2] sm:$0xff] (!%p252_p9)  ;;  %vm1143_vm1 = vmpackc.low (!%p252_p9), %vm348_vm0, %vm348_vm0  ;;  %v303_v55 = vld [vmem:[%s1275_s1 + $0x8] sm:$0x3] (!%p252_p9)  ;;  %v1027_v56 = vmov (!%p252_p9), 0.0  }
  0x12   : > { %340 = vperm.xlu0 (!%p252_p9), %952, %v336_v3   ;;  %953 = vset.pattern.permute.xlu1 (!%p252_p9), %v1026_v2  ;;  %v646_v6 = vld [vmem:[#allocation2] sm:$0x1] (!%p252_p9)  ;;  %vm543_vm2 = vcmask (!%p252_p9), 1041408   ;;  %vm1028_vm3 = vmmov (!%p252_p9), 1   ;;  %vm539_vm5 = vcmask (!%p252_p9), 80896   ;;  %vm631_vm6 = vcmask (!%p252_p9), 1044480  }
  0x13   : > { %614 = vmatprep.mubr.f32.mxu1 (!%p252_p9), %v1027_v56  ;;  %v533_v57 = vld [vmem:[%s1278_s4] sm:$0x1f] (!%p252_p9)  ;;  %vm904_vm4 = vmpackc.low (!%p252_p9), %vm543_vm2, %vm1028_vm3  ;;  %s1030_s9 = smov (!%p252_p9), [#allocation3]  }
  0x14   : > { %536 = vperm.xlu1 (!%p252_p9), %953, %v533_v57   ;;  %v623_v58 = vld [vmem:[%s1279_s5] sm:$0x1f] (!%p252_p9)  ;;  %s966_s10 = sshll.u32 (!%p252_p9), %s1030_s9, 4  ;;  %s967_s10 = int_to_ptr.vmem [resolvable:$false] %s966_s10 }
  0x15   : > { %s968_s15 = scalar_lea.vmem (!%p252_p9), %s967_s10, 64 }
  0x16   : > { %345 = vperm.xlu0 (!%p252_p9), %952, %v337_v4  }
  0x18   : > { %s293_s19 = scalar_select %p292_p10, %s1119_s14, 62  ;;  %626 = vperm.xlu1 %953, %v623_v58  }
  0x1a   : > { %s773_s22 = sshll.u32 %s293_s19, 3  ;;  %649 = vperm.xlu0 %952, %v646_v6   ;;  %s284_s19 = sand.u32 1, %s1016_s27  }
  0x1b   : > { %s1139_s25 = scalar_lea.vmem %s1274_s0, %s773_s22  ;;  %s771_s20 = sshll.u32 %s284_s19, 1 }
  0x1c   : > { %v320_v7 = vld [vmem:[%s1139_s25 + $0x80] sm:$0xff]  ;;  %v321_v8 = vld [vmem:[%s1139_s25 + $0x88] sm:$0xff]  ;;  %v322_v12 = vld [vmem:[%s1139_s25 + $0x90] sm:$0xff]  ;;  %s286_s21 = scalar_lea.vmem [#allocation3], %s771_s20  ;;  %s694_s6 = scalar_lea.sflag [#allocation4], %s284_s19 }
  0x1d   : > { %v304_v9 = vld [vmem:[%s1139_s25] sm:$0xff]  ;;  %v855_v10 = vpack.c.bf16 %v321_v8, %v320_v7  ;;  %v305_v11 = vld [vmem:[%s1139_s25 + $0x8] sm:$0xff]  ;;  %v323_v13 = vld [vmem:[%s1139_s25 + $0x98] sm:$0xff]  ;;  %s708_s22 = sshll.u32 %s286_s21, 4  ;;  %s1234_s22 = int_to_ptr.vmem [resolvable:$true] %s708_s22 }
  0x1e   : > { %v858_v14 = vpack.c.bf16 %v305_v11, %v304_v9  ;;  %v861_v15 = vpack.c.bf16 %v323_v13, %v322_v12  ;;  %v306_v16 = vld [vmem:[%s1139_s25 + $0x10] sm:$0xff]  ;;  %v307_v17 = vld [vmem:[%s1139_s25 + $0x18] sm:$0xff]  ;;  %v324_v18 = vld [vmem:[%s1139_s25 + $0xa0] sm:$0xff]  ;;  %s962_s30 = scalar_lea.vmem %s1234_s22, 32  ;;  %p969_p0 = scmp.lt.s32.totalorder %s1234_s22, %s967_s10 }
  0x1f   : > { %857 = vmatprep.subr.msk.bf16.mxu0 %vm1143_vm1, %v855_v10  ;;  %v325_v19 = vld [vmem:[%s1139_s25 + $0xa8] sm:$0xff]  ;;  %v864_v20 = vpack.c.bf16 %v307_v17, %v306_v16  ;;  %v308_v22 = vld [vmem:[%s1139_s25 + $0x20] sm:$0xff]  ;;  %v326_v24 = vld [vmem:[%s1139_s25 + $0xb0] sm:$0xff]  ;;  %p963_p11 = scmp.ne.s32.totalorder %s1234_s22, %s962_s30  ;;  %p970_p1 = scmp.lt.s32.totalorder %s968_s15, %s962_s30 }
  0x20   : > { %860 = vmatpush3.bf16.xpose.msk.msra.mxu0 %vm1143_vm1, %v858_v14  ;;  %v867_v21 = vpack.c.bf16 %v325_v19, %v324_v18  ;;  %v309_v23 = vld [vmem:[%s1139_s25 + $0x28] sm:$0xff]  ;;  %v327_v25 = vld [vmem:[%s1139_s25 + $0xb8] sm:$0xff]  ;;  %v310_v28 = vld [vmem:[%s1139_s25 + $0x30] sm:$0xff] }
  0x21   : > { %863 = vmatprep.subr.msk.bf16.mxu0 %vm1143_vm1, %v861_v15  ;;  %v870_v26 = vpack.c.bf16 %v309_v23, %v308_v22  ;;  %v873_v27 = vpack.c.bf16 %v327_v25, %v326_v24  ;;  %v311_v29 = vld [vmem:[%s1139_s25 + $0x38] sm:$0xff]  ;;  %v328_v30 = vld [vmem:[%s1139_s25 + $0xc0] sm:$0xff]  ;;  %v329_v31 = vld [vmem:[%s1139_s25 + $0xc8] sm:$0xff]  ;;  %p964_p12 = pnand %p963_p11, %p1109_p5  ;;  %p971_p2 = por %p970_p1, %p969_p0 }
  0x22   : > { %v876_v32 = vpack.c.bf16 %v311_v29, %v310_v28  ;;  %v879_v33 = vpack.c.bf16 %v329_v31, %v328_v30  ;;  %v312_v34 = vld [vmem:[%s1139_s25 + $0x40] sm:$0xff]  ;;  %v313_v35 = vld [vmem:[%s1139_s25 + $0x48] sm:$0xff]  ;;  %v330_v36 = vld [vmem:[%s1139_s25 + $0xd0] sm:$0xff] }
  0x23   : > { %v331_v37 = vld [vmem:[%s1139_s25 + $0xd8] sm:$0xff]  ;;  %v882_v38 = vpack.c.bf16 %v313_v35, %v312_v34  ;;  %v314_v40 = vld [vmem:[%s1139_s25 + $0x50] sm:$0xff]  ;;  %v332_v42 = vld [vmem:[%s1139_s25 + $0xe0] sm:$0xff]  ;;  %p965_p13 = pneg %p964_p12 }
  0x24   : > { %v885_v39 = vpack.c.bf16 %v331_v37, %v330_v36  ;;  %v315_v41 = vld [vmem:[%s1139_s25 + $0x58] sm:$0xff]  ;;  %v333_v43 = vld [vmem:[%s1139_s25 + $0xe8] sm:$0xff]  ;;  %v316_v46 = vld [vmem:[%s1139_s25 + $0x60] sm:$0xff] }
  0x25   : > { %v888_v44 = vpack.c.bf16 %v315_v41, %v314_v40  ;;  %v891_v45 = vpack.c.bf16 %v333_v43, %v332_v42  ;;  %v317_v47 = vld [vmem:[%s1139_s25 + $0x68] sm:$0xff]  ;;  %v334_v48 = vld [vmem:[%s1139_s25 + $0xf0] sm:$0xff]  ;;  %v335_v49 = vld [vmem:[%s1139_s25 + $0xf8] sm:$0xff]  ;;  %p972_p3 = pnand %p971_p2, %p965_p13 }
  0x26   : > { %v894_v50 = vpack.c.bf16 %v317_v47, %v316_v46  ;;  %v897_v51 = vpack.c.bf16 %v335_v49, %v334_v48  ;;  %v318_v52 = vld [vmem:[%s1139_s25 + $0x70] sm:$0xff]  ;;  %v319_v53 = vld [vmem:[%s1139_s25 + $0x78] sm:$0xff]  ;;  %v532_v11 = vld [vmem:[%s1277_s3] sm:$0x1f]  ;;  %v1029_v49 = vmov 1966171168   ;;  %s1232_s25 = scalar_lea.hbm %s1281_s7, %s1119_s14 }
  0x27   : > { %v900_v54 = vpack.c.bf16 %v319_v53, %v318_v52 }
  0x28   : > { %866 = vmatpush3.bf16.xpose.msk.msra.mxu0 %vm1143_vm1, %v864_v20 }
  0x29   : > { %869 = vmatprep.subr.msk.bf16.mxu0 %vm1143_vm1, %v867_v21  ;;  %v652_v21 = vlaneseq }
  0x2b   : > { %vm690_vm7 = vcmp.lt.s32.totalorder %v652_v21, 256 }
  0x30   : > { %872 = vmatpush3.bf16.xpose.msk.msra.mxu0 %vm1143_vm1, %v870_v26 }
  0x31   : > { %875 = vmatprep.subr.msk.bf16.mxu0 %vm1143_vm1, %v873_v27  ;;  %v653_v27 = vshrl.u32 %v652_v21, 7 }
  0x38   : > { %878 = vmatpush3.bf16.xpose.msk.msra.mxu0 %vm1143_vm1, %v876_v32  ;;  %v654_v32 = vsub.s32 0, %v653_v27 }
  0x39   : > { %881 = vmatprep.subr.msk.bf16.mxu0 %vm1143_vm1, %v879_v33 }
  0x40   : > { %884 = vmatpush3.bf16.xpose.msk.msra.mxu0 %vm1143_vm1, %v882_v38 }
  0x41   : > { %887 = vmatprep.subr.msk.bf16.mxu0 %vm1143_vm1, %v885_v39 }
  0x48   : > { %890 = vmatpush3.bf16.xpose.msk.msra.mxu0 %vm1143_vm1, %v888_v44 }
  0x49   : > { %893 = vmatprep.subr.msk.bf16.mxu0 %vm1143_vm1, %v891_v45 }
  0x50   : > { %896 = vmatpush3.bf16.xpose.msk.msra.mxu0 %vm1143_vm1, %v894_v50  ;;  %v674_v50 = vunpack.c.l.s4 %v1029_v49 }
  0x51   : > { %899 = vmatprep.subr.msk.bf16.mxu0 %vm1143_vm1, %v897_v51 }
  0x52   : > { %v675_v51 = vunpack.c.0.s8 %v674_v50 }
  0x54   : > { %v678_v53 = vsub.s32 %v675_v51, %v653_v27 }
  0x58   : > { %902 = vmatpush3.bf16.xpose.msk.msra.mxu0 %vm1143_vm1, %v900_v54 }
  0x5f   : > { %852 = vmatmul.mubr.msk.f32.vlgmr.msra.gmra.mrb[0].mxu0 %vm348_vm0, %v1124_v1 }
  0x60   : > { %853 = vmatprep.mubr.msk.f32.mxu0 %vm348_vm0, %v303_v55 }
  0x63   : > { %854 = vmatmul.mubr.msk.f32.gmra.mrb[2].mxu0 %vm348_vm0, %v303_v55 }
  0x91   : > { %v341_v59 = vpop.permute.xlu0 %340 }
  0x93   : > { %v537_v12 = vpop.permute.xlu1 %536 }
  0x95   : > { %v346_v63 = vpop.permute.xlu0 %345 }
  0x97   : > { %v627_v18 = vpop.permute.xlu1 %626 }
  0x99   : > { %v650_v34 = vpop.permute.xlu0 %649 }
  0x9a   : > { %v655_v38 = vrot.slane %v650_v34, %v654_v32 }
 0x132   : > { %v517_v60 = vpop.f32.mrb[0].mxu0 }
 0x133   : > { %v519_v61 = vpop.f32.mrb[1].mxu0  ;;  %v518_v62 = vadd.f32 %v517_v60, %v341_v59 }
 0x134   : > { %v520_v0 = vadd.f32 %v519_v61, %v341_v59 }
 0x135   : > { %v528_v5 = vmax.f32 %v518_v62, 0.0 }
 0x136   : > { %v523_v1 = vpop.f32.mrb[2].mxu0  ;;  %v529_v7 = vmax.f32 %v520_v0, 0.0 }
 0x137   : > { %v524_v2 = vadd.f32 %v523_v1, %v346_v63  ;;  %v525_v3 = vpop.f32.mrb[3].mxu0 }
 0x138   : > { %v526_v4 = vadd.f32 %v525_v3, %v346_v63 }
 0x139   : > { %v530_v6 = vmax.f32 %v524_v2, 0.0 }
 0x13a   : > { %v531_v8 = vmax.f32 %v526_v4, 0.0 }
 0x13b   : > { %v906_v9 = vpack.c.bf16 %v530_v6, %v528_v5 }
 0x13c   : > { %v903_v10 = vpack.c.bf16 %v531_v8, %v529_v7 }
 0x13e   : > { %905 = vmatprep.subr.msk.bf16.mxu1 %vm904_vm4, %v903_v10 }
 0x13f   : > { %908 = vmatpush1.bf16.msk.msra.mxu1 %vm904_vm4, %v906_v9 }
 0x142   : > { %810 = vmatmul.mubr.msk.f32.vlgmr.msra.gmra.mrb[0].mxu1 %vm539_vm5, %v532_v11 }
 0x215   : > { %v616_v13 = vpop.f32.mrb[0].mxu1 }
 0x216   : > { %v617_v14 = vadd.f32 %v616_v13, %v537_v12  ;;  %v618_v15 = vpop.f32.mrb[1].mxu1 }
 0x217   : > { %v619_v16 = vadd.f32 %v618_v15, %v537_v12 }
 0x218   : > { %v621_v17 = vmax.f32 %v617_v14, 0.0 }
 0x219   : > { %v622_v19 = vmax.f32 %v619_v16, 0.0 }
 0x21a   : > { %v629_v20 = vmul.f32 %v627_v18, %v621_v17 }
 0x21b   : > { %v630_v22 = vmul.f32 %v627_v18, %v622_v19 }
 0x21c   : > { %v632_v23 = vsel %vm631_vm6, %v629_v20, 0.0 }
 0x21d   : > { %v633_v24 = vrot.slane %v632_v23, 4  ;;  %v639_v25 = vsel %vm631_vm6, %v630_v22, 0.0 }
 0x21e   : > { %v640_v26 = vrot.slane %v639_v25, 4 }
 0x21f   : > { %v634_v28 = vadd.f32 %v633_v24, %v632_v23 }
 0x220   : > { %v641_v29 = vadd.f32 %v640_v26, %v639_v25 }
 0x221   : > { %v635_v30 = vrot.slane %v634_v28, 2 }
 0x222   : > { %v642_v31 = vrot.slane %v641_v29, 2 }
 0x223   : > { %v636_v33 = vadd.f32 %v635_v30, %v634_v28 }
 0x224   : > { %v643_v35 = vadd.f32 %v642_v31, %v641_v29 }
 0x225   : > { %v637_v36 = vrot.slane %v636_v33, 1 }
 0x226   : > { %v644_v37 = vrot.slane %v643_v35, 1 }
 0x227   : > { %v638_v39 = vadd.f32 %v637_v36, %v636_v33 }
 0x228   : > { %v645_v40 = vadd.f32 %v644_v37, %v643_v35 }
 0x229   : > { %v656_v41 = vadd.f32 %v655_v38, %v638_v39 }
 0x22a   : > { %v657_v42 = vadd.f32 %v655_v38, %v645_v40 }
 0x22b   : > { %v811_v43 = vmul.f32 -1.442695, %v656_v41 }
 0x22c   : > { %v812_v44 = vmul.f32 -1.442695, %v657_v42 }
 0x22d   : > { %954 = vpow2.f32 %v811_v43 }
 0x22e   : > { %956 = vpow2.f32 %v812_v44 }
 0x237   : > { %v955_v45 = vpop.eup %954 }
 0x238   : > { %v957_v46 = vpop.eup %956  ;;  %v664_v47 = vadd.f32 1.0, %v955_v45 }
 0x239   : > { %v665_v48 = vadd.f32 1.0, %v957_v46 }
 0x23a   : > { %958 = vrcp.f32 %v664_v47 }
 0x23b   : > { %960 = vrcp.f32 %v665_v48 }
 0x244   : > { %v959_v52 = vpop.eup %958 }
 0x245   : > { %v961_v54 = vpop.eup %960 }
 0x246   : > { %v672_v55 = vcombine.low %v959_v52, %v961_v54 }
 0x248   : > { %v679_v56 = vrot.slane %v672_v55, %v678_v53 }
 0x24a   : > { %v686_v57 = vrot.slane %v679_v56, %v678_v53 }
 0x24c   : > { %692 = vst.msk [vmem:[%s286_s21] sm:$0x3] %vm690_vm7, %v686_v57 }
 0x24d   : > { %975 = shalt.err (!%p972_p3)
}
 0x24e   : > { %s976_s14 = scalar_lea.hbm %s1232_s25, 32  ;;  %s980_s18 = scalar_lea.hbm %s1281_s7, 64 }
 0x24f   : > { %p977_p4 = scmp.ne.s32.totalorder %s1232_s25, %s976_s14  ;;  %p981_p9 = scmp.lt.u32.totalorder %s1232_s25, %s1281_s7 }
 0x250   : > { %p982_p10 = scmp.lt.u32.totalorder %s980_s18, %s976_s14  ;;  %p984_p12 = scmp.lt.u32.totalorder %s976_s14, %s1232_s25 }
 0x251   : > { %p978_p7 = pnand %p977_p4, %p1109_p5 }
 0x252   : > { %p983_p11 = por %p982_p10, %p981_p9 }
 0x253   : > { %p979_p8 = pneg %p978_p7 }
 0x254   : > { %p985_p13 = por %p984_p12, %p983_p11 }
 0x256   : > { %p986_p0 = pnand %p985_p13, %p979_p8 }
 0x258   : > { %989 = shalt.err (!%p986_p0)
}
 0x259   : > { %909 = dma.vmem_to_hbm [thread:$0]  (%p1109_p5), %s1234_s22, 32, %s1232_s25, %s694_s6  }
 0x25a PF: > { %p915_p1 = scmp.ge.s32.totalorder %s1024_s29, 2  ;;  %s720_s21 = sand.u32 1, %s1012_s26  }
 0x25b   : > { %s721_s23 = scalar_lea.sflag [#allocation4], %s720_s21 }
 0x25c   : > { %p912_p2 = pnand %p915_p1, %p1113_p6 }
 0x25e   : > { %1007 = dma.done.wait (!%p912_p2), %s721_s23, 32  }
 0x25f   : > { %1009 = vsyncadd (!%p912_p2), %s721_s23, 4294967264  ;;  %p19_p3 = scmp.ge.s32.totalorder %s1097_s8, 4   ;;  %s1286_s26 = smov %s1016_s27 }
 0x260   : > { %s1287_s27 = smov %s1020_s28  ;;  %s1288_s28 = smov %s1107_s11 }
 0x261   : > { %s1289_s29 = smov %s1097_s8  ;;  %21 = sbr.rel (!%p19_p3) target bundleno = 6 (0x6), region = 83 }
 0x268   :  { %726 = vsyncpa [#allocation4], 1 }
 0x269   :  { %728 = vsyncpa [#allocation4 + $0x1], 1 }

</bundles_post_ra>
